<compile_context>
chip_gen: v7x
topology: tpu7x:2x2x1
jax: 0.10.0
libtpu: 0.0.40
codegen_flags: <defaults>
</compile_context>

<pallas_src>
import functools

import jax
import jax.numpy as jnp
from jax.experimental import pallas as pl
from jax.experimental.pallas import tpu as pltpu


# ---------------------------------------------------------------------------
# Fused kernel: wavefront-pipelined 2-layer LSTM + final Linear, one invocation.
# ---------------------------------------------------------------------------
def _fused_lstm_fc_kernel(x_ref, w1e_ref, wblock_ref, badd_ref, fcw_ref, fcb_ref,
                          o_ref, *, seq_len, batch, hidden):
    H, T, N = hidden, seq_len, batch
    f32 = jnp.float32
    prec = jax.lax.Precision.DEFAULT

    # ---------------- Prologue (off the recurrent critical path) ----------------
    # Hoisted layer-1 input projection for ALL timesteps in one MXU call; w1e already
    # has the permuted-gate layout with zeros in the layer-2 columns.  x arrives in
    # its native batch-major row order (row = n*T + t).
    x_bf = x_ref[...].astype(jnp.bfloat16)                            # (N*T, D)
    xe_all = jnp.dot(x_bf, w1e_ref[...], preferred_element_type=f32,
                     precision=prec)                                  # (N*T, 8H)
    xe3 = xe_all.reshape(N, T, 8 * H)                                 # free re-tiling
    badd = jnp.broadcast_to(badd_ref[...], (N, 8 * H))                # fused b1|b2
    # Per-wave additive slabs (x-projection + biases), extracted ONCE here so no
    # sublane extraction sits on the recurrent chain.  Wave T adds biases only.
    xadd = [xe3[:, t, :] + badd for t in range(T)] + [badd]

    wblock = wblock_ref[...]         # (2H, 8H) bf16: [[Whh1->L1, Wih2->L2],[0, Whh2->L2]]

    lane = jax.lax.broadcasted_iota(jnp.int32, (N, 2 * H), 1)
    keep_l1 = lane < H               # used once, to reset layer-2 state after wave 0

    hcat = jnp.zeros((N, 2 * H), f32)   # [h1[w-1] | h2[w-2]]
    ccat = jnp.zeros((N, 2 * H), f32)   # [c1[w-1] | c2[w-2]]

    # -------- Wavefront recurrence: T+1 waves, ONE matmul + ONE cell per wave -------
    # Wave w computes layer-1 step w (gates = x[w]@Wih1 + b1 + h1[w-1]@Whh1) and
    # layer-2 step w-1 (gates = h1[w-1]@Wih2 + h2[w-2]@Whh2 + b2) simultaneously.
    for w in range(T + 1):
        rec = jnp.dot(hcat.astype(jnp.bfloat16), wblock,
                      preferred_element_type=f32, precision=prec)     # (N, 8H)
        gates = rec + xadd[w]
        # Full-slab nonlinearities, sliced afterwards (columns: [i1 i2 f1 f2 g1 g2 o1 o2]).
        sg = jax.nn.sigmoid(gates)
        th = jnp.tanh(gates)
        i_cat = sg[:, 0 * H:2 * H]
        f_cat = sg[:, 2 * H:4 * H]
        g_cat = th[:, 4 * H:6 * H]
        o_cat = sg[:, 6 * H:8 * H]
        ccat = f_cat * ccat + i_cat * g_cat
        hcat = o_cat * jnp.tanh(ccat)
        if w == 0:
            # Layer-2 half of wave 0 is a placeholder; layer-2 step 0 (at wave 1)
            # must see h2 = c2 = 0.
            hcat = jnp.where(keep_l1, hcat, 0.0)
            ccat = jnp.where(keep_l1, ccat, 0.0)

    # After wave T, hcat[:, H:2H] == h2[T-1].  Fused classifier head: only the
    # (N, n_class) logits leave the kernel.
    h2_last = hcat[:, H:2 * H].astype(jnp.bfloat16)
    o_ref[...] = (jnp.dot(h2_last, fcw_ref[...], preferred_element_type=f32,
                          precision=prec)
                  + fcb_ref[...])


# ---------------------------------------------------------------------------
# Parameter construction (deterministic, PyTorch-style uniform init).
# ---------------------------------------------------------------------------
def init_params(key, input_dim, hidden_dim, num_layers, n_class):
    k = 1.0 / jnp.sqrt(hidden_dim)
    params = {"lstm": []}
    for layer in range(num_layers):
        d_in = input_dim if layer == 0 else hidden_dim
        key, k1, k2, k3, k4 = jax.random.split(key, 5)
        w_ih = jax.random.uniform(k1, (4 * hidden_dim, d_in), jnp.float32, -k, k)
        w_hh = jax.random.uniform(k2, (4 * hidden_dim, hidden_dim), jnp.float32, -k, k)
        b_ih = jax.random.uniform(k3, (4 * hidden_dim,), jnp.float32, -k, k)
        b_hh = jax.random.uniform(k4, (4 * hidden_dim,), jnp.float32, -k, k)
        params["lstm"].append((w_ih, w_hh, b_ih, b_hh))
    key, k5, k6 = jax.random.split(key, 3)
    kf = 1.0 / jnp.sqrt(hidden_dim)
    params["fc_w"] = jax.random.uniform(k5, (n_class, hidden_dim), jnp.float32, -kf, kf)
    params["fc_b"] = jax.random.uniform(k6, (n_class,), jnp.float32, -kf, kf)
    return params


def prepare_params(params):
    """One-time conversion to kernel layout (permuted/blocked bf16 weights, fused biases)."""
    (w_ih1, w_hh1, b_ih1, b_hh1), (w_ih2, w_hh2, b_ih2, b_hh2) = params["lstm"]
    H = w_hh1.shape[1]
    D = w_ih1.shape[1]

    def interleave(l1, l2):
        # l1, l2: (rows, 4H) with PyTorch gate order [i f g o] along the columns.
        # Returns (rows, 8H) with columns [i1 i2 f1 f2 g1 g2 o1 o2].
        cols = []
        for g in range(4):
            cols.append(l1[:, g * H:(g + 1) * H])
            cols.append(l2[:, g * H:(g + 1) * H])
        return jnp.concatenate(cols, axis=1)

    zeros_d = jnp.zeros((D, 4 * H), jnp.float32)
    zeros_h = jnp.zeros((H, 4 * H), jnp.float32)

    # Layer-1 input projection embedded in the 8H permuted-gate layout (layer-2 cols 0).
    w1e = interleave(jnp.asarray(w_ih1.T, jnp.float32), zeros_d)                 # (D, 8H)
    # Wavefront block weight: [[Whh1 -> L1 cols, Wih2 -> L2 cols],
    #                          [0              , Whh2 -> L2 cols]]
    wblock = jnp.concatenate(
        [interleave(jnp.asarray(w_hh1.T, jnp.float32), jnp.asarray(w_ih2.T, jnp.float32)),
         interleave(zeros_h, jnp.asarray(w_hh2.T, jnp.float32))], axis=0)        # (2H, 8H)
    badd = interleave((b_ih1 + b_hh1)[None, :], (b_ih2 + b_hh2)[None, :])        # (1, 8H)

    return {
        "w1e": w1e.astype(jnp.bfloat16),
        "wblock": wblock.astype(jnp.bfloat16),
        "badd": badd.astype(jnp.float32),
        "fcw_t": jnp.asarray(params["fc_w"].T, jnp.bfloat16),                    # (H, C)
        "fcb": params["fc_b"].reshape(1, -1).astype(jnp.float32),                # (1, C)
    }


# ---------------------------------------------------------------------------
# Full forward pass (matches LSTMClassifier.forward, defaults).
# ---------------------------------------------------------------------------
@jax.jit
def lstm_classifier_forward(x_ntd, kp):
    N, T, D = x_ntd.shape
    H = kp["wblock"].shape[0] // 2
    C = kp["fcw_t"].shape[1]
    # Native batch-major row order (row = n*T + t): reshape is a free bitcast, so there
    # is no host-side transpose / extra XLA dispatch before the pallas_call.
    x2d = x_ntd.reshape(N * T, D).astype(jnp.float32)

    kernel = functools.partial(_fused_lstm_fc_kernel, seq_len=T, batch=N, hidden=H)
    vmem_specs = [pl.BlockSpec(memory_space=pltpu.MemorySpace.VMEM) for _ in range(6)]
    return pl.pallas_call(
        kernel,
        out_shape=jax.ShapeDtypeStruct((N, C), jnp.float32),
        in_specs=vmem_specs,
        out_specs=pl.BlockSpec(memory_space=pltpu.MemorySpace.VMEM),
    )(x2d, kp["w1e"], kp["wblock"], kp["badd"], kp["fcw_t"], kp["fcb"])


# ---------------------------------------------------------------------------
# Pure-JAX reference for verification.
# ---------------------------------------------------------------------------
def reference_forward(x_ntd, params, hidden_dim):
    h_seq = x_ntd.astype(jnp.float32)
    N = x_ntd.shape[0]
    for (w_ih, w_hh, b_ih, b_hh) in params["lstm"]:
        def step(carry, x_t):
            h, c = carry
            gates = x_t @ w_ih.T + h @ w_hh.T + b_ih + b_hh
            i, f, g, o = jnp.split(gates, 4, axis=-1)
            c = jax.nn.sigmoid(f) * c + jax.nn.sigmoid(i) * jnp.tanh(g)
            h = jax.nn.sigmoid(o) * jnp.tanh(c)
            return (h, c), h
        init = (jnp.zeros((N, hidden_dim)), jnp.zeros((N, hidden_dim)))
        _, out = jax.lax.scan(step, init, jnp.transpose(h_seq, (1, 0, 2)))
        h_seq = jnp.transpose(out, (1, 0, 2))
    last = h_seq[:, -1, :]
    return last @ params["fc_w"].T + params["fc_b"]


if __name__ == "__main__":
    # Small shapes consistent with the module: batch=2, seq=8, input_dim=37,
    # hidden_dim=32, num_layers=2, n_class=3.
    N, T, INPUT_DIM = 2, 8, 37
    HIDDEN_DIM, NUM_LAYERS, N_CLASS = 32, 2, 3

    key = jax.random.PRNGKey(0)
    key, kx = jax.random.split(key)
    x = jax.random.normal(kx, (N, T, INPUT_DIM), dtype=jnp.float32)
    params = init_params(key, INPUT_DIM, HIDDEN_DIM, NUM_LAYERS, N_CLASS)
    kparams = prepare_params(params)   # kernel-layout params, built once

    logits = lstm_classifier_forward(x, kparams)
    logits = jax.block_until_ready(logits)

    ref = reference_forward(x, params, HIDDEN_DIM)
    assert logits.shape == (N, N_CLASS)
    assert jnp.allclose(logits, ref, atol=2e-4, rtol=2e-4), (
        f"max abs diff = {jnp.max(jnp.abs(logits - ref))}")

    print("KERNEL_OK")
</pallas_src>

<mosaic_0001>
module attributes {stable_mosaic.version = 11 : i64} {
  func.func @_fused_lstm_fc_kernel(%arg0: memref<16x37xf32, #tpu.memory_space<vmem>>, %arg1: memref<37x256xbf16, #tpu.memory_space<vmem>>, %arg2: memref<64x256xbf16, #tpu.memory_space<vmem>>, %arg3: memref<1x256xf32, #tpu.memory_space<vmem>>, %arg4: memref<32x3xbf16, #tpu.memory_space<vmem>>, %arg5: memref<1x3xf32, #tpu.memory_space<vmem>>, %arg6: memref<2x3xf32, #tpu.memory_space<vmem>>) attributes {dimension_semantics = [], scalar_prefetch = 0 : i64, scratch_operands = 0 : i64, tpu.core_type = #tpu.core_type<tc>} {
    %c0 = arith.constant 0 : index
    %c0_0 = arith.constant 0 : index
    %0 = vector.load %arg0[%c0, %c0_0] : memref<16x37xf32, #tpu.memory_space<vmem>>, vector<16x37xf32>
    %1 = arith.truncf %0 : vector<16x37xf32> to vector<16x37xbf16>
    %c0_1 = arith.constant 0 : index
    %c0_2 = arith.constant 0 : index
    %2 = vector.load %arg1[%c0_1, %c0_2] : memref<37x256xbf16, #tpu.memory_space<vmem>>, vector<37x256xbf16>
    %cst = arith.constant dense<0.000000e+00> : vector<16x256xf32>
    %3 = tpu.matmul %1, %2, %cst {dimension_numbers = #tpu.dot_dimension_numbers<[1], [0], [0], [1], [0, 0, 1, 1], [], []>} : vector<16x37xbf16>, vector<37x256xbf16>, vector<16x256xf32> -> vector<16x256xf32>
    %4 = vector.shape_cast %3 : vector<16x256xf32> to vector<2x8x256xf32>
    %c0_3 = arith.constant 0 : index
    %c0_4 = arith.constant 0 : index
    %5 = vector.load %arg3[%c0_3, %c0_4] : memref<1x256xf32, #tpu.memory_space<vmem>>, vector<1x256xf32>
    %6 = vector.shape_cast %5 : vector<1x256xf32> to vector<1x256xf32>
    %7 = vector.broadcast %6 : vector<1x256xf32> to vector<2x256xf32>
    %8 = vector.extract_strided_slice %4 {offsets = [0, 0, 0], sizes = [2, 1, 256], strides = [1, 1, 1]} : vector<2x8x256xf32> to vector<2x1x256xf32>
    %9 = vector.shape_cast %8 : vector<2x1x256xf32> to vector<2x256xf32>
    %10 = arith.addf %9, %7 : vector<2x256xf32>
    %11 = vector.extract_strided_slice %4 {offsets = [0, 1, 0], sizes = [2, 1, 256], strides = [1, 1, 1]} : vector<2x8x256xf32> to vector<2x1x256xf32>
    %12 = vector.shape_cast %11 : vector<2x1x256xf32> to vector<2x256xf32>
    %13 = arith.addf %12, %7 : vector<2x256xf32>
    %14 = vector.extract_strided_slice %4 {offsets = [0, 2, 0], sizes = [2, 1, 256], strides = [1, 1, 1]} : vector<2x8x256xf32> to vector<2x1x256xf32>
    %15 = vector.shape_cast %14 : vector<2x1x256xf32> to vector<2x256xf32>
    %16 = arith.addf %15, %7 : vector<2x256xf32>
    %17 = vector.extract_strided_slice %4 {offsets = [0, 3, 0], sizes = [2, 1, 256], strides = [1, 1, 1]} : vector<2x8x256xf32> to vector<2x1x256xf32>
    %18 = vector.shape_cast %17 : vector<2x1x256xf32> to vector<2x256xf32>
    %19 = arith.addf %18, %7 : vector<2x256xf32>
    %20 = vector.extract_strided_slice %4 {offsets = [0, 4, 0], sizes = [2, 1, 256], strides = [1, 1, 1]} : vector<2x8x256xf32> to vector<2x1x256xf32>
    %21 = vector.shape_cast %20 : vector<2x1x256xf32> to vector<2x256xf32>
    %22 = arith.addf %21, %7 : vector<2x256xf32>
    %23 = vector.extract_strided_slice %4 {offsets = [0, 5, 0], sizes = [2, 1, 256], strides = [1, 1, 1]} : vector<2x8x256xf32> to vector<2x1x256xf32>
    %24 = vector.shape_cast %23 : vector<2x1x256xf32> to vector<2x256xf32>
    %25 = arith.addf %24, %7 : vector<2x256xf32>
    %26 = vector.extract_strided_slice %4 {offsets = [0, 6, 0], sizes = [2, 1, 256], strides = [1, 1, 1]} : vector<2x8x256xf32> to vector<2x1x256xf32>
    %27 = vector.shape_cast %26 : vector<2x1x256xf32> to vector<2x256xf32>
    %28 = arith.addf %27, %7 : vector<2x256xf32>
    %29 = vector.extract_strided_slice %4 {offsets = [0, 7, 0], sizes = [2, 1, 256], strides = [1, 1, 1]} : vector<2x8x256xf32> to vector<2x1x256xf32>
    %30 = vector.shape_cast %29 : vector<2x1x256xf32> to vector<2x256xf32>
    %31 = arith.addf %30, %7 : vector<2x256xf32>
    %c0_5 = arith.constant 0 : index
    %c0_6 = arith.constant 0 : index
    %32 = vector.load %arg2[%c0_5, %c0_6] : memref<64x256xbf16, #tpu.memory_space<vmem>>, vector<64x256xbf16>
    %33 = tpu.iota {dimensions = array<i32: 1>} : vector<2x64xi32>
    %c32_i32 = arith.constant 32 : i32
    %34 = vector.broadcast %c32_i32 : i32 to vector<2x64xi32>
    %35 = arith.cmpi slt, %33, %34 : vector<2x64xi32>
    %cst_7 = arith.constant 0.000000e+00 : f32
    %36 = vector.broadcast %cst_7 : f32 to vector<2x64xf32>
    %cst_8 = arith.constant 0.000000e+00 : f32
    %37 = vector.broadcast %cst_8 : f32 to vector<2x64xf32>
    %38 = arith.truncf %36 : vector<2x64xf32> to vector<2x64xbf16>
    %cst_9 = arith.constant dense<0.000000e+00> : vector<2x256xf32>
    %39 = tpu.matmul %38, %32, %cst_9 {dimension_numbers = #tpu.dot_dimension_numbers<[1], [0], [0], [1], [0, 0, 1, 1], [], []>} : vector<2x64xbf16>, vector<64x256xbf16>, vector<2x256xf32> -> vector<2x256xf32>
    %40 = arith.addf %39, %10 : vector<2x256xf32>
    %41 = arith.negf %40 : vector<2x256xf32>
    %42 = math.exp %41 : vector<2x256xf32>
    %cst_10 = arith.constant 1.000000e+00 : f32
    %43 = vector.broadcast %cst_10 : f32 to vector<2x256xf32>
    %44 = arith.addf %43, %42 : vector<2x256xf32>
    %45 = arith.divf %43, %44 : vector<2x256xf32>
    %46 = math.tanh %40 : vector<2x256xf32>
    %47 = vector.extract_strided_slice %45 {offsets = [0, 0], sizes = [2, 64], strides = [1, 1]} : vector<2x256xf32> to vector<2x64xf32>
    %48 = vector.extract_strided_slice %45 {offsets = [0, 64], sizes = [2, 64], strides = [1, 1]} : vector<2x256xf32> to vector<2x64xf32>
    %49 = vector.extract_strided_slice %46 {offsets = [0, 128], sizes = [2, 64], strides = [1, 1]} : vector<2x256xf32> to vector<2x64xf32>
    %50 = vector.extract_strided_slice %45 {offsets = [0, 192], sizes = [2, 64], strides = [1, 1]} : vector<2x256xf32> to vector<2x64xf32>
    %51 = arith.mulf %48, %37 : vector<2x64xf32>
    %52 = arith.mulf %47, %49 : vector<2x64xf32>
    %53 = arith.addf %51, %52 : vector<2x64xf32>
    %54 = math.tanh %53 : vector<2x64xf32>
    %55 = arith.mulf %50, %54 : vector<2x64xf32>
    %cst_11 = arith.constant 0.000000e+00 : f32
    %56 = vector.broadcast %cst_11 : f32 to vector<2x64xf32>
    %57 = arith.select %35, %55, %56 : vector<2x64xi1>, vector<2x64xf32>
    %cst_12 = arith.constant 0.000000e+00 : f32
    %58 = vector.broadcast %cst_12 : f32 to vector<2x64xf32>
    %59 = arith.select %35, %53, %58 : vector<2x64xi1>, vector<2x64xf32>
    %60 = arith.truncf %57 : vector<2x64xf32> to vector<2x64xbf16>
    %cst_13 = arith.constant dense<0.000000e+00> : vector<2x256xf32>
    %61 = tpu.matmul %60, %32, %cst_13 {dimension_numbers = #tpu.dot_dimension_numbers<[1], [0], [0], [1], [0, 0, 1, 1], [], []>} : vector<2x64xbf16>, vector<64x256xbf16>, vector<2x256xf32> -> vector<2x256xf32>
    %62 = arith.addf %61, %13 : vector<2x256xf32>
    %63 = arith.negf %62 : vector<2x256xf32>
    %64 = math.exp %63 : vector<2x256xf32>
    %cst_14 = arith.constant 1.000000e+00 : f32
    %65 = vector.broadcast %cst_14 : f32 to vector<2x256xf32>
    %66 = arith.addf %65, %64 : vector<2x256xf32>
    %67 = arith.divf %65, %66 : vector<2x256xf32>
    %68 = math.tanh %62 : vector<2x256xf32>
    %69 = vector.extract_strided_slice %67 {offsets = [0, 0], sizes = [2, 64], strides = [1, 1]} : vector<2x256xf32> to vector<2x64xf32>
    %70 = vector.extract_strided_slice %67 {offsets = [0, 64], sizes = [2, 64], strides = [1, 1]} : vector<2x256xf32> to vector<2x64xf32>
    %71 = vector.extract_strided_slice %68 {offsets = [0, 128], sizes = [2, 64], strides = [1, 1]} : vector<2x256xf32> to vector<2x64xf32>
    %72 = vector.extract_strided_slice %67 {offsets = [0, 192], sizes = [2, 64], strides = [1, 1]} : vector<2x256xf32> to vector<2x64xf32>
    %73 = arith.mulf %70, %59 : vector<2x64xf32>
    %74 = arith.mulf %69, %71 : vector<2x64xf32>
    %75 = arith.addf %73, %74 : vector<2x64xf32>
    %76 = math.tanh %75 : vector<2x64xf32>
    %77 = arith.mulf %72, %76 : vector<2x64xf32>
    %78 = arith.truncf %77 : vector<2x64xf32> to vector<2x64xbf16>
    %cst_15 = arith.constant dense<0.000000e+00> : vector<2x256xf32>
    %79 = tpu.matmul %78, %32, %cst_15 {dimension_numbers = #tpu.dot_dimension_numbers<[1], [0], [0], [1], [0, 0, 1, 1], [], []>} : vector<2x64xbf16>, vector<64x256xbf16>, vector<2x256xf32> -> vector<2x256xf32>
    %80 = arith.addf %79, %16 : vector<2x256xf32>
    %81 = arith.negf %80 : vector<2x256xf32>
    %82 = math.exp %81 : vector<2x256xf32>
    %cst_16 = arith.constant 1.000000e+00 : f32
    %83 = vector.broadcast %cst_16 : f32 to vector<2x256xf32>
    %84 = arith.addf %83, %82 : vector<2x256xf32>
    %85 = arith.divf %83, %84 : vector<2x256xf32>
    %86 = math.tanh %80 : vector<2x256xf32>
    %87 = vector.extract_strided_slice %85 {offsets = [0, 0], sizes = [2, 64], strides = [1, 1]} : vector<2x256xf32> to vector<2x64xf32>
    %88 = vector.extract_strided_slice %85 {offsets = [0, 64], sizes = [2, 64], strides = [1, 1]} : vector<2x256xf32> to vector<2x64xf32>
    %89 = vector.extract_strided_slice %86 {offsets = [0, 128], sizes = [2, 64], strides = [1, 1]} : vector<2x256xf32> to vector<2x64xf32>
    %90 = vector.extract_strided_slice %85 {offsets = [0, 192], sizes = [2, 64], strides = [1, 1]} : vector<2x256xf32> to vector<2x64xf32>
    %91 = arith.mulf %88, %75 : vector<2x64xf32>
    %92 = arith.mulf %87, %89 : vector<2x64xf32>
    %93 = arith.addf %91, %92 : vector<2x64xf32>
    %94 = math.tanh %93 : vector<2x64xf32>
    %95 = arith.mulf %90, %94 : vector<2x64xf32>
    %96 = arith.truncf %95 : vector<2x64xf32> to vector<2x64xbf16>
    %cst_17 = arith.constant dense<0.000000e+00> : vector<2x256xf32>
    %97 = tpu.matmul %96, %32, %cst_17 {dimension_numbers = #tpu.dot_dimension_numbers<[1], [0], [0], [1], [0, 0, 1, 1], [], []>} : vector<2x64xbf16>, vector<64x256xbf16>, vector<2x256xf32> -> vector<2x256xf32>
    %98 = arith.addf %97, %19 : vector<2x256xf32>
    %99 = arith.negf %98 : vector<2x256xf32>
    %100 = math.exp %99 : vector<2x256xf32>
    %cst_18 = arith.constant 1.000000e+00 : f32
    %101 = vector.broadcast %cst_18 : f32 to vector<2x256xf32>
    %102 = arith.addf %101, %100 : vector<2x256xf32>
    %103 = arith.divf %101, %102 : vector<2x256xf32>
    %104 = math.tanh %98 : vector<2x256xf32>
    %105 = vector.extract_strided_slice %103 {offsets = [0, 0], sizes = [2, 64], strides = [1, 1]} : vector<2x256xf32> to vector<2x64xf32>
    %106 = vector.extract_strided_slice %103 {offsets = [0, 64], sizes = [2, 64], strides = [1, 1]} : vector<2x256xf32> to vector<2x64xf32>
    %107 = vector.extract_strided_slice %104 {offsets = [0, 128], sizes = [2, 64], strides = [1, 1]} : vector<2x256xf32> to vector<2x64xf32>
    %108 = vector.extract_strided_slice %103 {offsets = [0, 192], sizes = [2, 64], strides = [1, 1]} : vector<2x256xf32> to vector<2x64xf32>
    %109 = arith.mulf %106, %93 : vector<2x64xf32>
    %110 = arith.mulf %105, %107 : vector<2x64xf32>
    %111 = arith.addf %109, %110 : vector<2x64xf32>
    %112 = math.tanh %111 : vector<2x64xf32>
    %113 = arith.mulf %108, %112 : vector<2x64xf32>
    %114 = arith.truncf %113 : vector<2x64xf32> to vector<2x64xbf16>
    %cst_19 = arith.constant dense<0.000000e+00> : vector<2x256xf32>
    %115 = tpu.matmul %114, %32, %cst_19 {dimension_numbers = #tpu.dot_dimension_numbers<[1], [0], [0], [1], [0, 0, 1, 1], [], []>} : vector<2x64xbf16>, vector<64x256xbf16>, vector<2x256xf32> -> vector<2x256xf32>
    %116 = arith.addf %115, %22 : vector<2x256xf32>
    %117 = arith.negf %116 : vector<2x256xf32>
    %118 = math.exp %117 : vector<2x256xf32>
    %cst_20 = arith.constant 1.000000e+00 : f32
    %119 = vector.broadcast %cst_20 : f32 to vector<2x256xf32>
    %120 = arith.addf %119, %118 : vector<2x256xf32>
    %121 = arith.divf %119, %120 : vector<2x256xf32>
    %122 = math.tanh %116 : vector<2x256xf32>
    %123 = vector.extract_strided_slice %121 {offsets = [0, 0], sizes = [2, 64], strides = [1, 1]} : vector<2x256xf32> to vector<2x64xf32>
    %124 = vector.extract_strided_slice %121 {offsets = [0, 64], sizes = [2, 64], strides = [1, 1]} : vector<2x256xf32> to vector<2x64xf32>
    %125 = vector.extract_strided_slice %122 {offsets = [0, 128], sizes = [2, 64], strides = [1, 1]} : vector<2x256xf32> to vector<2x64xf32>
    %126 = vector.extract_strided_slice %121 {offsets = [0, 192], sizes = [2, 64], strides = [1, 1]} : vector<2x256xf32> to vector<2x64xf32>
    %127 = arith.mulf %124, %111 : vector<2x64xf32>
    %128 = arith.mulf %123, %125 : vector<2x64xf32>
    %129 = arith.addf %127, %128 : vector<2x64xf32>
    %130 = math.tanh %129 : vector<2x64xf32>
    %131 = arith.mulf %126, %130 : vector<2x64xf32>
    %132 = arith.truncf %131 : vector<2x64xf32> to vector<2x64xbf16>
    %cst_21 = arith.constant dense<0.000000e+00> : vector<2x256xf32>
    %133 = tpu.matmul %132, %32, %cst_21 {dimension_numbers = #tpu.dot_dimension_numbers<[1], [0], [0], [1], [0, 0, 1, 1], [], []>} : vector<2x64xbf16>, vector<64x256xbf16>, vector<2x256xf32> -> vector<2x256xf32>
    %134 = arith.addf %133, %25 : vector<2x256xf32>
    %135 = arith.negf %134 : vector<2x256xf32>
    %136 = math.exp %135 : vector<2x256xf32>
    %cst_22 = arith.constant 1.000000e+00 : f32
    %137 = vector.broadcast %cst_22 : f32 to vector<2x256xf32>
    %138 = arith.addf %137, %136 : vector<2x256xf32>
    %139 = arith.divf %137, %138 : vector<2x256xf32>
    %140 = math.tanh %134 : vector<2x256xf32>
    %141 = vector.extract_strided_slice %139 {offsets = [0, 0], sizes = [2, 64], strides = [1, 1]} : vector<2x256xf32> to vector<2x64xf32>
    %142 = vector.extract_strided_slice %139 {offsets = [0, 64], sizes = [2, 64], strides = [1, 1]} : vector<2x256xf32> to vector<2x64xf32>
    %143 = vector.extract_strided_slice %140 {offsets = [0, 128], sizes = [2, 64], strides = [1, 1]} : vector<2x256xf32> to vector<2x64xf32>
    %144 = vector.extract_strided_slice %139 {offsets = [0, 192], sizes = [2, 64], strides = [1, 1]} : vector<2x256xf32> to vector<2x64xf32>
    %145 = arith.mulf %142, %129 : vector<2x64xf32>
    %146 = arith.mulf %141, %143 : vector<2x64xf32>
    %147 = arith.addf %145, %146 : vector<2x64xf32>
    %148 = math.tanh %147 : vector<2x64xf32>
    %149 = arith.mulf %144, %148 : vector<2x64xf32>
    %150 = arith.truncf %149 : vector<2x64xf32> to vector<2x64xbf16>
    %cst_23 = arith.constant dense<0.000000e+00> : vector<2x256xf32>
    %151 = tpu.matmul %150, %32, %cst_23 {dimension_numbers = #tpu.dot_dimension_numbers<[1], [0], [0], [1], [0, 0, 1, 1], [], []>} : vector<2x64xbf16>, vector<64x256xbf16>, vector<2x256xf32> -> vector<2x256xf32>
    %152 = arith.addf %151, %28 : vector<2x256xf32>
    %153 = arith.negf %152 : vector<2x256xf32>
    %154 = math.exp %153 : vector<2x256xf32>
    %cst_24 = arith.constant 1.000000e+00 : f32
    %155 = vector.broadcast %cst_24 : f32 to vector<2x256xf32>
    %156 = arith.addf %155, %154 : vector<2x256xf32>
    %157 = arith.divf %155, %156 : vector<2x256xf32>
    %158 = math.tanh %152 : vector<2x256xf32>
    %159 = vector.extract_strided_slice %157 {offsets = [0, 0], sizes = [2, 64], strides = [1, 1]} : vector<2x256xf32> to vector<2x64xf32>
    %160 = vector.extract_strided_slice %157 {offsets = [0, 64], sizes = [2, 64], strides = [1, 1]} : vector<2x256xf32> to vector<2x64xf32>
    %161 = vector.extract_strided_slice %158 {offsets = [0, 128], sizes = [2, 64], strides = [1, 1]} : vector<2x256xf32> to vector<2x64xf32>
    %162 = vector.extract_strided_slice %157 {offsets = [0, 192], sizes = [2, 64], strides = [1, 1]} : vector<2x256xf32> to vector<2x64xf32>
    %163 = arith.mulf %160, %147 : vector<2x64xf32>
    %164 = arith.mulf %159, %161 : vector<2x64xf32>
    %165 = arith.addf %163, %164 : vector<2x64xf32>
    %166 = math.tanh %165 : vector<2x64xf32>
    %167 = arith.mulf %162, %166 : vector<2x64xf32>
    %168 = arith.truncf %167 : vector<2x64xf32> to vector<2x64xbf16>
    %cst_25 = arith.constant dense<0.000000e+00> : vector<2x256xf32>
    %169 = tpu.matmul %168, %32, %cst_25 {dimension_numbers = #tpu.dot_dimension_numbers<[1], [0], [0], [1], [0, 0, 1, 1], [], []>} : vector<2x64xbf16>, vector<64x256xbf16>, vector<2x256xf32> -> vector<2x256xf32>
    %170 = arith.addf %169, %31 : vector<2x256xf32>
    %171 = arith.negf %170 : vector<2x256xf32>
    %172 = math.exp %171 : vector<2x256xf32>
    %cst_26 = arith.constant 1.000000e+00 : f32
    %173 = vector.broadcast %cst_26 : f32 to vector<2x256xf32>
    %174 = arith.addf %173, %172 : vector<2x256xf32>
    %175 = arith.divf %173, %174 : vector<2x256xf32>
    %176 = math.tanh %170 : vector<2x256xf32>
    %177 = vector.extract_strided_slice %175 {offsets = [0, 0], sizes = [2, 64], strides = [1, 1]} : vector<2x256xf32> to vector<2x64xf32>
    %178 = vector.extract_strided_slice %175 {offsets = [0, 64], sizes = [2, 64], strides = [1, 1]} : vector<2x256xf32> to vector<2x64xf32>
    %179 = vector.extract_strided_slice %176 {offsets = [0, 128], sizes = [2, 64], strides = [1, 1]} : vector<2x256xf32> to vector<2x64xf32>
    %180 = vector.extract_strided_slice %175 {offsets = [0, 192], sizes = [2, 64], strides = [1, 1]} : vector<2x256xf32> to vector<2x64xf32>
    %181 = arith.mulf %178, %165 : vector<2x64xf32>
    %182 = arith.mulf %177, %179 : vector<2x64xf32>
    %183 = arith.addf %181, %182 : vector<2x64xf32>
    %184 = math.tanh %183 : vector<2x64xf32>
    %185 = arith.mulf %180, %184 : vector<2x64xf32>
    %186 = arith.truncf %185 : vector<2x64xf32> to vector<2x64xbf16>
    %cst_27 = arith.constant dense<0.000000e+00> : vector<2x256xf32>
    %187 = tpu.matmul %186, %32, %cst_27 {dimension_numbers = #tpu.dot_dimension_numbers<[1], [0], [0], [1], [0, 0, 1, 1], [], []>} : vector<2x64xbf16>, vector<64x256xbf16>, vector<2x256xf32> -> vector<2x256xf32>
    %188 = arith.addf %187, %7 : vector<2x256xf32>
    %189 = arith.negf %188 : vector<2x256xf32>
    %190 = math.exp %189 : vector<2x256xf32>
    %cst_28 = arith.constant 1.000000e+00 : f32
    %191 = vector.broadcast %cst_28 : f32 to vector<2x256xf32>
    %192 = arith.addf %191, %190 : vector<2x256xf32>
    %193 = arith.divf %191, %192 : vector<2x256xf32>
    %194 = math.tanh %188 : vector<2x256xf32>
    %195 = vector.extract_strided_slice %193 {offsets = [0, 0], sizes = [2, 64], strides = [1, 1]} : vector<2x256xf32> to vector<2x64xf32>
    %196 = vector.extract_strided_slice %193 {offsets = [0, 64], sizes = [2, 64], strides = [1, 1]} : vector<2x256xf32> to vector<2x64xf32>
    %197 = vector.extract_strided_slice %194 {offsets = [0, 128], sizes = [2, 64], strides = [1, 1]} : vector<2x256xf32> to vector<2x64xf32>
    %198 = vector.extract_strided_slice %193 {offsets = [0, 192], sizes = [2, 64], strides = [1, 1]} : vector<2x256xf32> to vector<2x64xf32>
    %199 = arith.mulf %196, %183 : vector<2x64xf32>
    %200 = arith.mulf %195, %197 : vector<2x64xf32>
    %201 = arith.addf %199, %200 : vector<2x64xf32>
    %202 = math.tanh %201 : vector<2x64xf32>
    %203 = arith.mulf %198, %202 : vector<2x64xf32>
    %204 = vector.extract_strided_slice %203 {offsets = [0, 32], sizes = [2, 32], strides = [1, 1]} : vector<2x64xf32> to vector<2x32xf32>
    %205 = arith.truncf %204 : vector<2x32xf32> to vector<2x32xbf16>
    %c0_29 = arith.constant 0 : index
    %c0_30 = arith.constant 0 : index
    %206 = vector.load %arg4[%c0_29, %c0_30] : memref<32x3xbf16, #tpu.memory_space<vmem>>, vector<32x3xbf16>
    %cst_31 = arith.constant dense<0.000000e+00> : vector<2x3xf32>
    %207 = tpu.matmul %205, %206, %cst_31 {dimension_numbers = #tpu.dot_dimension_numbers<[1], [0], [0], [1], [0, 0, 1, 1], [], []>} : vector<2x32xbf16>, vector<32x3xbf16>, vector<2x3xf32> -> vector<2x3xf32>
    %c0_32 = arith.constant 0 : index
    %c0_33 = arith.constant 0 : index
    %208 = vector.load %arg5[%c0_32, %c0_33] : memref<1x3xf32, #tpu.memory_space<vmem>>, vector<1x3xf32>
    %209 = vector.broadcast %208 : vector<1x3xf32> to vector<2x3xf32>
    %210 = arith.addf %207, %209 : vector<2x3xf32>
    %c0_34 = arith.constant 0 : index
    %c0_35 = arith.constant 0 : index
    %211 = vector.load %arg6[%c0_34, %c0_35] : memref<2x3xf32, #tpu.memory_space<vmem>>, vector<2x3xf32>
    tpu.vector_store %arg6[%c0_34, %c0_35], %210 {strides = array<i32>} : memref<2x3xf32, #tpu.memory_space<vmem>>, vector<2x3xf32>,
    return
  }
}

</mosaic_0001>

<bundles_post_ra>
// kernel: lstm_classifier_forward.1
= control target key start
LH: loop header
LB: loop body
LE: loop exit
PB: predicated region body
PF: predicated region fallthrough
CT: control target
= control target key end

     0   :  { %11 = vsyncpa [#allocation3], 0  ;;  %s1567_s0 = inlined_call_operand.vmem [shape: f32[16,37], index: 0, kind: input, shape index: {}]   ;;  %s1568_s1 = inlined_call_operand.hbm [shape: bf16[37,256], index: 1, kind: input, shape index: {}]   ;;  %s1569_s2 = inlined_call_operand.hbm [shape: bf16[64,256], index: 2, kind: input, shape index: {}]   ;;  %s1570_s3 = inlined_call_operand.vmem [shape: f32[1,256], index: 3, kind: input, shape index: {}]   ;;  %s1571_s4 = inlined_call_operand.vmem [shape: bf16[32,3], index: 4, kind: input, shape index: {}]   ;;  %s1572_s5 = inlined_call_operand.vmem [shape: f32[1,3], index: 5, kind: input, shape index: {}]   ;;  %s1573_s6 = inlined_call_operand.hbm [shape: f32[2,3], index: 6, kind: output, shape index: {}]  }
   0x1   :  { %12 = vsyncpa [#allocation6], 0 }
   0x2   :  { %13 = vsyncpa [#allocation4], 0  ;;  %s1271_s21 = smov [#allocation2]   ;;  %s1199_s25 = scalar_lea.hbm %s1568_s1, 640 }
   0x3   :  { %s21_s22 = sshll.u32 %s1271_s21, 4  ;;  %p1200_p0 = scmp.ne.s32.totalorder %s1568_s1, %s1199_s25  ;;  %s22_s22 = int_to_ptr.vmem [resolvable:$true] %s21_s22 }
   0x4   :  { %p1203_p1 = scmp.lt.u32.totalorder %s1199_s25, %s1568_s1 }
   0x6   :  { %p1205_p2 = pnand %p1203_p1, %p1200_p0 }
   0x8   :  { %1208 = shalt.err (!%p1205_p2)
}
   0x9   :  { %s1209_s30 = scalar_lea.vmem %s22_s22, 640  ;;  %p1214_p4 = scmp.lt.s32.totalorder %s22_s22, %s22_s22 }
   0xa   :  { %p1210_p3 = scmp.ne.s32.totalorder %s22_s22, %s1209_s30  ;;  %p1215_p5 = scmp.lt.s32.totalorder %s1209_s30, %s1209_s30 }
   0xc   :  { %p1216_p6 = por %p1215_p5, %p1214_p4 }
   0xe   :  { %p1217_p7 = pnand %p1216_p6, %p1210_p3 }
  0x10   :  { %1220 = shalt.err (!%p1217_p7)
}
  0x11   :  { %s1272_s7 = smov 128   ;;  %s1273_s8 = smov 8  }
  0x12   :  { %27 = dma.hbm_to_vmem [thread:$0]  %s1568_s1, 640, %s22_s22, [#allocation3], %s1272_s7, %s1272_s7, %s1273_s8  }
  0x13   :  { %s1274_s11 = smov [#allocation5]   ;;  %s1221_s15 = scalar_lea.hbm %s1569_s2, 1024 }
  0x14   :  { %s33_s12 = sshll.u32 %s1274_s11, 4  ;;  %p1222_p8 = scmp.ne.s32.totalorder %s1569_s2, %s1221_s15  ;;  %s34_s12 = int_to_ptr.vmem [resolvable:$true] %s33_s12 }
  0x15   :  { %p1225_p9 = scmp.lt.u32.totalorder %s1221_s15, %s1569_s2 }
  0x17   :  { %p1227_p10 = pnand %p1225_p9, %p1222_p8 }
  0x19   :  { %1230 = shalt.err (!%p1227_p10)
}
  0x1a   :  { %s1231_s20 = scalar_lea.vmem %s34_s12, 1024  ;;  %p1236_p12 = scmp.lt.s32.totalorder %s34_s12, %s34_s12 }
  0x1b   :  { %p1232_p11 = scmp.ne.s32.totalorder %s34_s12, %s1231_s20  ;;  %p1237_p13 = scmp.lt.s32.totalorder %s1231_s20, %s1231_s20 }
  0x1d   :  { %p1238_p0 = por %p1237_p13, %p1236_p12 }
  0x1f   :  { %p1239_p1 = pnand %p1238_p0, %p1232_p11 }
  0x21   :  { %1242 = shalt.err (!%p1239_p1)
}
  0x22   :  { %39 = dma.hbm_to_vmem [thread:$0]  %s1569_s2, 1024, %s34_s12, [#allocation6], %s1272_s7, %s1272_s7, %s1273_s8  }
  0x23   :  { %1265 = dma.done.wait [#allocation3], 640  }
  0x24   :  { %1266 = vsyncadd [#allocation3], 4294966656 }
  0x25   :  { %1267 = dma.done.wait [#allocation6], 1024  }
  0x26   :  { %1268 = vsyncadd [#allocation6], 4294966272  ;;  %v1275_v0 = vmov 0   ;;  %vm90_vm0 = vcmask 1041408   ;;  %v1069_v1 = vld [vmem:[#allocation2 + $0x4] ss:$8 sps:$4 sm:$0xff]   ;;  %v145_v24 = vlaneseq }
  0x27   :  { %132 = vmatprep.mubr.bf16.mxu0 %v1275_v0  ;;  %257 = vmatprep.mubr.bf16.mxu1 %v1275_v0  ;;  %v1343_v2 = vld [vmem:[#allocation5 + $0x4] ss:$8 sps:$4 sm:$0xff]   ;;  %vm91_vm1 = vcmask 1042432   ;;  %v1073_v3 = vld [vmem:[#allocation2] ss:$8 sps:$4 sm:$0xff]   ;;  %v1276_v5 = vmov 65535  }
  0x28   :  { %100 = vmatprep.subr.bf16.mxu0 %v1069_v1  ;;  %v1345_v4 = vld [vmem:[#allocation5] ss:$8 sps:$4 sm:$0xff]   ;;  %v92_v6 = vsel %vm90_vm0, 4294967295, %v1276_v5  ;;  %225 = vmatprep.subr.bf16.mxu1 %v1343_v2  ;;  %v1075_v7 = vld [vmem:[#allocation2 + $0x14] ss:$8 sps:$4 sm:$0xff]   ;;  %v53_v17 = vld [vmem:[%s1567_s0] sm:$0xff] }
  0x29   :  { %101 = vmatpush1.bf16.msra.mxu0 %v1073_v3  ;;  %226 = vmatpush1.bf16.msra.mxu1 %v1345_v4  ;;  %v1349_v8 = vld [vmem:[#allocation5 + $0x14] ss:$8 sps:$4 sm:$0xff]   ;;  %v1079_v9 = vld [vmem:[#allocation2 + $0x10] ss:$8 sps:$4 sm:$0xff]   ;;  %v93_v12 = vsel %vm91_vm1, %v92_v6, 0  ;;  %v54_v20 = vld [vmem:[%s1567_s0 + $0x8] sm:$0xff] }
  0x2a   :  { %102 = vmatprep.subr.bf16.mxu0 %v1075_v7  ;;  %v1351_v10 = vld [vmem:[#allocation5 + $0x10] ss:$8 sps:$4 sm:$0xff]   ;;  %227 = vmatprep.subr.bf16.mxu1 %v1349_v8  ;;  %v1354_v14 = vld [vmem:[#allocation5 + $0x24] ss:$8 sps:$4 sm:$0xff]   ;;  %v1356_v16 = vld [vmem:[#allocation5 + $0x20] ss:$8 sps:$4 sm:$0xff]   ;;  %v55_v22 = vpack.c.bf16 %v54_v20, %v53_v17 }
  0x2b   :  { %v60_v11 = vld [vmem:[#allocation2 + $0x20] sm:$0x77]  ;;  %vm86_vm2 = vcmask 302080   ;;  %v146_v25 = vshrl.u32 %v145_v24, 7  ;;  %vm215_vm3 = vcmask 1041409   ;;  %vm221_vm5 = vcmask 523264  }
  0x2c   :  { %v1007_v13 = vcombine.high %v60_v11, %v60_v11  ;;  %v1006_v15 = vcombine.low %v60_v11, %v60_v11  ;;  %v1365_v21 = vld [vmem:[#allocation5 + $0x34] ss:$8 sps:$4 sm:$0xff]   ;;  %v1369_v23 = vld [vmem:[#allocation5 + $0x30] ss:$8 sps:$4 sm:$0xff]   ;;  %vm1279_vm6 = vmmov 0   ;;  %s1280_s30 = smov 32  }
  0x2d   :  { %103 = vmatpush1.bf16.msra.mxu0 %v1079_v9  ;;  %228 = vmatpush1.bf16.msra.mxu1 %v1351_v10  ;;  %v147_v26 = vsub.s32 0, %v146_v25  ;;  %v143_v27 = vld [vmem:[%s1570_s3] sm:$0x3]  ;;  %v151_v28 = vsub.s32 1, %v146_v25  ;;  %s1277_s3 = smov 64   ;;  %vm940_vm7 = vcmask 261120  }
  0x2e   :  { %v98_v18 = vand.u32 %v1007_v13, %v93_v12  ;;  %v95_v19 = vand.u32 %v1006_v15, %v93_v12  ;;  %229 = vmatprep.subr.bf16.mxu1 %v1354_v14  ;;  %s1281_s8 = smov [#allocation7]   ;;  %vm984_vm8 = vcmask 17408  }
  0x2f   :  { %v1398_v29 = vrot.slane %v143_v27, %v147_v26  ;;  %v1400_v30 = vrot.slane %v143_v27, %v151_v28  ;;  %s992_s9 = sshll.u32 %s1281_s8, 4  ;;  %s993_s9 = int_to_ptr.vmem [resolvable:$true] %s992_s9 }
  0x30   :  { %104 = vmatprep.subr.bf16.mxu0 %v98_v18  ;;  %s1243_s10 = scalar_lea.vmem %s993_s9, 32  ;;  %p1248_p3 = scmp.lt.s32.totalorder %s993_s9, %s993_s9 }
  0x31   :  { %105 = vmatpush1.bf16.msra.mxu0 %v95_v19  ;;  %230 = vmatpush1.bf16.msra.mxu1 %v1356_v16  ;;  %p1244_p2 = scmp.ne.s32.totalorder %s993_s9, %s1243_s10  ;;  %p1249_p4 = scmp.lt.s32.totalorder %s1243_s10, %s1243_s10 }
  0x32   :  { %231 = vmatprep.subr.bf16.mxu1 %v1365_v21  ;;  %308 = vmatprep.subr.bf16.mxu0 %v1343_v2 }
  0x33   :  { %p1250_p5 = por %p1249_p4, %p1248_p3 }
  0x34   :  { %1008 = vmatmul.mubr.msk.bf16.vlgmr.msra.gmra.mrb[0].mxu0 %vm86_vm2, %v55_v22 }
  0x35   :  { %232 = vmatpush1.bf16.msra.mxu1 %v1369_v23  ;;  %309 = vmatpush1.bf16.msra.mxu0 %v1345_v4  ;;  %p1251_p6 = pnand %p1250_p5, %p1244_p2 }
  0x36   :  { %310 = vmatprep.subr.bf16.mxu0 %v1349_v8  ;;  %340 = vmatprep.mubr.bf16.mxu0 %v1275_v0 }
  0x37   :  { %390 = vmatprep.subr.bf16.mxu1 %v1343_v2 }
  0x38   :  { %258 = vmatmul.mubr.bf16.vlgmr.msra.gmra.mrb[0].mxu1 %v1275_v0 }
  0x39   :  { %311 = vmatpush1.bf16.msra.mxu0 %v1351_v10  ;;  %391 = vmatpush1.bf16.msra.mxu1 %v1345_v4 }
  0x3a   :  { %312 = vmatprep.subr.bf16.mxu0 %v1354_v14  ;;  %392 = vmatprep.subr.bf16.mxu1 %v1349_v8 }
  0x3b   :  { %422 = vmatprep.mubr.bf16.mxu1 %v1275_v0 }
  0x3d   :  { %313 = vmatpush1.bf16.msra.mxu0 %v1356_v16  ;;  %393 = vmatpush1.bf16.msra.mxu1 %v1351_v10 }
  0x3e   :  { %314 = vmatprep.subr.bf16.mxu0 %v1365_v21  ;;  %394 = vmatprep.subr.bf16.mxu1 %v1354_v14 }
  0x41   :  { %315 = vmatpush1.bf16.msra.mxu0 %v1369_v23  ;;  %395 = vmatpush1.bf16.msra.mxu1 %v1356_v16 }
  0x42   :  { %396 = vmatprep.subr.bf16.mxu1 %v1365_v21  ;;  %468 = vmatprep.subr.bf16.mxu0 %v1343_v2 }
  0x45   :  { %397 = vmatpush1.bf16.msra.mxu1 %v1369_v23 }
  0x46   :  { %546 = vmatprep.subr.bf16.mxu1 %v1343_v2 }
 0x107   :  { %v134_v31 = vpop.f32.mrb[0].mxu0 }
 0x108   :  { %v155_v32 = vadd.f32 %v1398_v29, %v134_v31  ;;  %v136_v33 = vpop.f32.mrb[1].mxu0 }
 0x109   :  { %v156_v34 = vadd.f32 %v1400_v30, %v136_v33  ;;  %v138_v35 = vpop.f32.mrb[2].mxu0 }
 0x10a   :  { %v157_v36 = vadd.f32 %v1398_v29, %v138_v35  ;;  %v140_v37 = vpop.f32.mrb[3].mxu0  ;;  %v299_v38 = vrot.slane %v155_v32, 1  ;;  %v379_v39 = vrot.slane %v155_v32, 2  ;;  %v457_v40 = vrot.slane %v155_v32, 3 }
 0x10b   :  { %v158_v41 = vadd.f32 %v1400_v30, %v140_v37  ;;  %v259_v42 = vpop.f32.mrb[0].mxu1  ;;  %v301_v43 = vrot.slane %v156_v34, 1  ;;  %v382_v44 = vrot.slane %v156_v34, 2  ;;  %v460_v45 = vrot.slane %v156_v34, 3 }
 0x10c   :  { %v214_v46 = vrot.slane %v157_v36, 7  ;;  %v261_v47 = vpop.f32.mrb[1].mxu1  ;;  %v1407_v48 = vsel %vm215_vm3, %v157_v36, %v299_v38  ;;  %v380_v49 = vrot.slane %v157_v36, 1  ;;  %v458_v50 = vrot.slane %v157_v36, 2 }
 0x10d   :  { %v217_v51 = vrot.slane %v158_v41, 7  ;;  %v263_v52 = vpop.f32.mrb[2].mxu1  ;;  %v1410_v53 = vsel %vm215_vm3, %v158_v41, %v301_v43  ;;  %v383_v54 = vrot.slane %v158_v41, 1  ;;  %v461_v55 = vrot.slane %v158_v41, 2 }
 0x10e   :  { %v216_v56 = vsel %vm215_vm3, %v214_v46, %v155_v32  ;;  %v264_v57 = vpop.f32.mrb[3].mxu1  ;;  %v1414_v58 = vsel %vm215_vm3, %v380_v49, %v379_v39  ;;  %v1417_v59 = vsel %vm215_vm3, %v458_v50, %v457_v40  ;;  %v535_v60 = vrot.slane %v155_v32, 4 }
 0x10f   :  { %v260_v61 = vadd.f32 %v259_v42, %v216_v56  ;;  %v218_v62 = vsel %vm215_vm3, %v217_v51, %v156_v34  ;;  %v1421_v63 = vsel %vm215_vm3, %v383_v54, %v382_v44  ;;  %v1424_v1 = vsel %vm215_vm3, %v461_v55, %v460_v45 }
 0x110   :  { %v262_v3 = vadd.f32 %v261_v47, %v218_v62  ;;  %v536_v5 = vrot.slane %v157_v36, 3  ;;  %v538_v6 = vrot.slane %v156_v34, 4  ;;  %v539_v7 = vrot.slane %v158_v41, 3 }
 0x111   :  { %v1017_v9 = vmul.f32 -1.442695, %v260_v61  ;;  %v613_v11 = vrot.slane %v155_v32, 5  ;;  %v614_v12 = vrot.slane %v157_v36, 4  ;;  %v616_v18 = vrot.slane %v156_v34, 5 }
 0x112   :  { %v1427_v13 = vsel %vm215_vm3, %v536_v5, %v535_v60  ;;  %v1430_v15 = vsel %vm215_vm3, %v539_v7, %v538_v6  ;;  %v617_v19 = vrot.slane %v158_v41, 4  ;;  %v691_v20 = vrot.slane %v155_v32, 6 }
 0x113   :  { %1091 = vpow2.f32 %v1017_v9  ;;  %v1433_v17 = vsel %vm215_vm3, %v614_v12, %v613_v11  ;;  %v692_v22 = vrot.slane %v157_v36, 5  ;;  %v694_v25 = vrot.slane %v156_v34, 6 }
 0x114   :  { %v695_v26 = vrot.slane %v158_v41, 5  ;;  %v1436_v27 = vsel %vm215_vm3, %v617_v19, %v616_v18  ;;  %v769_v28 = vrot.slane %v155_v32, 7  ;;  %v770_v31 = vrot.slane %v157_v36, 6 }
 0x115   :  { %v1439_v33 = vsel %vm215_vm3, %v692_v22, %v691_v20  ;;  %v772_v37 = vrot.slane %v156_v34, 7  ;;  %v773_v38 = vrot.slane %v158_v41, 6  ;;  %1093 = vtanh.f32 %v262_v3 }
 0x116   :  { %v1442_v35 = vsel %vm215_vm3, %v695_v26, %v694_v25  ;;  %v1445_v39 = vsel %vm215_vm3, %v770_v31, %v769_v28  ;;  %v1018_v45 = vmul.f32 -1.442695, %v262_v3  ;;  %v168_v54 = vand.u32 127, %v145_v24 }
 0x117   :  { %v1448_v40 = vsel %vm215_vm3, %v773_v38, %v772_v37 }
 0x118   :  { %vm169_vm4 = vcmp.lt.s32.totalorder %v168_v54, 32 }
 0x11d   :  { %v1092_v42 = vpop.eup %1091 }
 0x11e   :  { %v272_v43 = vadd.f32 1.0, %v1092_v42 }
 0x11f   :  { %v1094_v32 = vpop.eup %1093 }
 0x120   :  { %1095 = vrcp.f32 %v272_v43 }
 0x121   :  { %1097 = vpow2.f32 %v1018_v45 }
 0x12a   :  { %v1096_v36 = vpop.eup %1095 }
 0x12b   :  { %v280_v44 = vmul.f32 %v1096_v36, %v1094_v32  ;;  %v1098_v34 = vpop.eup %1097  ;;  %v279_v46 = vmul.f32 0.0, %v1096_v36 }
 0x12c   :  { %v273_v41 = vadd.f32 1.0, %v1098_v34 }
 0x12d   :  { %282 = vrot.lane.b32.xlu0 %v280_v44, %s1277_s3 }
 0x12e   :  { %1099 = vrcp.f32 %v273_v41 }
 0x138   :  { %v1100_v50 = vpop.eup %1099 }
 0x19f   :  { %v283_v47 = vpop.permute.xlu0 %282 }
 0x1a0   :  { %v285_v49 = vadd.f32 %v283_v47, %v279_v46 }
 0x1a2   :  { %1101 = vtanh.f32 %v285_v49  ;;  %294 = vrot.lane.b32.xlu1 %v285_v49, %s1277_s3 }
 0x1ac   :  { %v1102_v51 = vpop.eup %1101 }
 0x1ad   :  { %v287_v52 = vmul.f32 %v1102_v51, %v1100_v50 }
 0x1af   :  { %289 = vrot.lane.b32.xlu0 %v287_v52, %s1277_s3 }
 0x214   :  { %v295_v55 = vpop.permute.xlu1 %294 }
 0x215   :  { %v297_v56 = vsel %vm169_vm4, %v295_v55, 0.0 }
 0x216   :  { %363 = vrot.lane.b32.xlu1 %v297_v56, %s1277_s3 }
 0x221   :  { %v290_v57 = vpop.permute.xlu0 %289 }
 0x222   :  { %v292_v60 = vsel %vm169_vm4, %v290_v57, 0.0 }
 0x223   :  { %v298_v61 = vpack.c.bf16 %v292_v60, %v292_v60 }
 0x225   :  { %1019 = vmatmul.mubr.msk.bf16.vlgmr.msra.gmra.mrb[4].mxu0 %vm221_vm5, %v298_v61 }
 0x226   :  { %469 = vmatpush1.bf16.msra.mxu0 %v1345_v4  ;;  %500 = vmatprep.mubr.bf16.mxu0 %v1275_v0 }
 0x227   :  { %470 = vmatprep.subr.bf16.mxu0 %v1349_v8 }
 0x22a   :  { %471 = vmatpush1.bf16.msra.mxu0 %v1351_v10 }
 0x22b   :  { %472 = vmatprep.subr.bf16.mxu0 %v1354_v14 }
 0x22e   :  { %473 = vmatpush1.bf16.msra.mxu0 %v1356_v16 }
 0x22f   :  { %474 = vmatprep.subr.bf16.mxu0 %v1365_v21 }
 0x232   :  { %475 = vmatpush1.bf16.msra.mxu0 %v1369_v23 }
 0x233   :  { %624 = vmatprep.subr.bf16.mxu0 %v1343_v2 }
 0x2f8   :  { %v342_v24 = vpop.f32.mrb[4].mxu0 }
 0x2f9   :  { %v343_v62 = vadd.f32 %v342_v24, %v1407_v48  ;;  %v344_v3 = vpop.f32.mrb[5].mxu0  ;;  %v364_v48 = vpop.permute.xlu1 %363 }
 0x2fa   :  { %v345_v5 = vadd.f32 %v344_v3, %v1410_v53  ;;  %v346_v6 = vpop.f32.mrb[6].mxu0 }
 0x2fb   :  { %v1020_v7 = vmul.f32 -1.442695, %v343_v62  ;;  %v347_v9 = vpop.f32.mrb[7].mxu0 }
 0x2fc   :  { %v1021_v22 = vmul.f32 -1.442695, %v345_v5 }
 0x2fd   :  { %1103 = vpow2.f32 %v1020_v7 }
 0x2fe   :  { %1105 = vtanh.f32 %v345_v5 }
 0x307   :  { %v1104_v11 = vpop.eup %1103 }
 0x308   :  { %v355_v12 = vadd.f32 1.0, %v1104_v11  ;;  %v1106_v18 = vpop.eup %1105 }
 0x30a   :  { %1107 = vrcp.f32 %v355_v12 }
 0x30b   :  { %1109 = vpow2.f32 %v1021_v22 }
 0x314   :  { %v1108_v19 = vpop.eup %1107 }
 0x315   :  { %v367_v20 = vmul.f32 %v1108_v19, %v1106_v18  ;;  %v1110_v25 = vpop.eup %1109  ;;  %v366_v28 = vmul.f32 %v1108_v19, %v364_v48 }
 0x316   :  { %v356_v26 = vadd.f32 1.0, %v1110_v25 }
 0x317   :  { %369 = vrot.lane.b32.xlu0 %v367_v20, %s1277_s3 }
 0x318   :  { %1111 = vrcp.f32 %v356_v26 }
 0x322   :  { %v1112_v37 = vpop.eup %1111 }
 0x389   :  { %v370_v53 = vpop.permute.xlu0 %369 }
 0x38a   :  { %v372_v31 = vadd.f32 %v370_v53, %v366_v28 }
 0x38c   :  { %1113 = vtanh.f32 %v372_v31 }
 0x396   :  { %v1114_v38 = vpop.eup %1113 }
 0x397   :  { %v374_v42 = vmul.f32 %v1114_v38, %v1112_v37 }
 0x399   :  { %v375_v43 = vpack.c.bf16 %v374_v42, %v374_v42 }
 0x39b   :  { %377 = vrot.lane.b32.xlu1 %v375_v43, %s1277_s3 }
 0x40d   :  { %v378_v32 = vpop.permute.xlu1 %377 }
 0x40e   :  { %1022 = vmatmul.mubr.msk.bf16.vlgmr.msra.gmra.mrb[4].mxu1 %vm221_vm5, %v378_v32 }
 0x40f   :  { %547 = vmatpush1.bf16.msra.mxu1 %v1345_v4  ;;  %578 = vmatprep.mubr.bf16.mxu1 %v1275_v0 }
 0x410   :  { %548 = vmatprep.subr.bf16.mxu1 %v1349_v8 }
 0x413   :  { %549 = vmatpush1.bf16.msra.mxu1 %v1351_v10 }
 0x414   :  { %550 = vmatprep.subr.bf16.mxu1 %v1354_v14 }
 0x417   :  { %551 = vmatpush1.bf16.msra.mxu1 %v1356_v16 }
 0x418   :  { %552 = vmatprep.subr.bf16.mxu1 %v1365_v21 }
 0x41b   :  { %553 = vmatpush1.bf16.msra.mxu1 %v1369_v23 }
 0x41c   :  { %702 = vmatprep.subr.bf16.mxu1 %v1343_v2 }
 0x4e1   :  { %v424_v36 = vpop.f32.mrb[4].mxu1 }
 0x4e2   :  { %v425_v44 = vadd.f32 %v424_v36, %v1414_v58  ;;  %v426_v45 = vpop.f32.mrb[5].mxu1 }
 0x4e3   :  { %v427_v34 = vadd.f32 %v426_v45, %v1421_v63  ;;  %v428_v41 = vpop.f32.mrb[6].mxu1 }
 0x4e4   :  { %v1023_v46 = vmul.f32 -1.442695, %v425_v44  ;;  %v429_v47 = vpop.f32.mrb[7].mxu1 }
 0x4e5   :  { %v1024_v55 = vmul.f32 -1.442695, %v427_v34 }
 0x4e6   :  { %1115 = vpow2.f32 %v1023_v46 }
 0x4e7   :  { %1117 = vtanh.f32 %v427_v34 }
 0x4f0   :  { %v1116_v49 = vpop.eup %1115 }
 0x4f1   :  { %v437_v50 = vadd.f32 1.0, %v1116_v49  ;;  %v1118_v51 = vpop.eup %1117 }
 0x4f3   :  { %1119 = vrcp.f32 %v437_v50 }
 0x4f4   :  { %1121 = vpow2.f32 %v1024_v55 }
 0x4fd   :  { %v1120_v52 = vpop.eup %1119 }
 0x4fe   :  { %v445_v54 = vmul.f32 %v1120_v52, %v1118_v51  ;;  %v1122_v56 = vpop.eup %1121  ;;  %v444_v57 = vmul.f32 %v1120_v52, %v372_v31 }
 0x4ff   :  { %v438_v58 = vadd.f32 1.0, %v1122_v56 }
 0x500   :  { %447 = vrot.lane.b32.xlu0 %v445_v54, %s1277_s3 }
 0x501   :  { %1123 = vrcp.f32 %v438_v58 }
 0x50b   :  { %v1124_v61 = vpop.eup %1123 }
 0x572   :  { %v448_v60 = vpop.permute.xlu0 %447 }
 0x573   :  { %v450_v63 = vadd.f32 %v448_v60, %v444_v57 }
 0x575   :  { %1125 = vtanh.f32 %v450_v63 }
 0x57f   :  { %v1126_v24 = vpop.eup %1125 }
 0x580   :  { %v452_v62 = vmul.f32 %v1126_v24, %v1124_v61 }
 0x582   :  { %v453_v3 = vpack.c.bf16 %v452_v62, %v452_v62 }
 0x584   :  { %455 = vrot.lane.b32.xlu1 %v453_v3, %s1277_s3 }
 0x5f6   :  { %v456_v5 = vpop.permute.xlu1 %455 }
 0x5f7   :  { %1025 = vmatmul.mubr.msk.bf16.vlgmr.msra.gmra.mrb[8].mxu0 %vm221_vm5, %v456_v5 }
 0x5f8   :  { %625 = vmatpush1.bf16.msra.mxu0 %v1345_v4  ;;  %656 = vmatprep.mubr.bf16.mxu0 %v1275_v0 }
 0x5f9   :  { %626 = vmatprep.subr.bf16.mxu0 %v1349_v8 }
 0x5fc   :  { %627 = vmatpush1.bf16.msra.mxu0 %v1351_v10 }
 0x5fd   :  { %628 = vmatprep.subr.bf16.mxu0 %v1354_v14 }
 0x600   :  { %629 = vmatpush1.bf16.msra.mxu0 %v1356_v16 }
 0x601   :  { %630 = vmatprep.subr.bf16.mxu0 %v1365_v21 }
 0x604   :  { %631 = vmatpush1.bf16.msra.mxu0 %v1369_v23 }
 0x605   :  { %780 = vmatprep.subr.bf16.mxu0 %v1343_v2 }
 0x6ca   :  { %v502_v6 = vpop.f32.mrb[8].mxu0 }
 0x6cb   :  { %v503_v7 = vadd.f32 %v502_v6, %v1417_v59  ;;  %v504_v9 = vpop.f32.mrb[9].mxu0 }
 0x6cc   :  { %v505_v11 = vadd.f32 %v504_v9, %v1424_v1  ;;  %v506_v12 = vpop.f32.mrb[10].mxu0 }
 0x6cd   :  { %v1026_v18 = vmul.f32 -1.442695, %v503_v7  ;;  %v507_v19 = vpop.f32.mrb[11].mxu0 }
 0x6ce   :  { %v1027_v28 = vmul.f32 -1.442695, %v505_v11 }
 0x6cf   :  { %1127 = vpow2.f32 %v1026_v18 }
 0x6d0   :  { %1129 = vtanh.f32 %v505_v11 }
 0x6d9   :  { %v1128_v20 = vpop.eup %1127 }
 0x6da   :  { %v515_v22 = vadd.f32 1.0, %v1128_v20  ;;  %v1130_v25 = vpop.eup %1129 }
 0x6dc   :  { %1131 = vrcp.f32 %v515_v22 }
 0x6dd   :  { %1133 = vpow2.f32 %v1027_v28 }
 0x6e6   :  { %v1132_v48 = vpop.eup %1131 }
 0x6e7   :  { %v523_v26 = vmul.f32 %v1132_v48, %v1130_v25  ;;  %v1134_v53 = vpop.eup %1133  ;;  %v522_v31 = vmul.f32 %v1132_v48, %v450_v63 }
 0x6e8   :  { %v516_v59 = vadd.f32 1.0, %v1134_v53 }
 0x6e9   :  { %525 = vrot.lane.b32.xlu0 %v523_v26, %s1277_s3 }
 0x6ea   :  { %1135 = vrcp.f32 %v516_v59 }
 0x6f4   :  { %v1136_v38 = vpop.eup %1135 }
 0x75b   :  { %v526_v37 = vpop.permute.xlu0 %525 }
 0x75c   :  { %v528_v1 = vadd.f32 %v526_v37, %v522_v31 }
 0x75e   :  { %1137 = vtanh.f32 %v528_v1 }
 0x768   :  { %v1138_v42 = vpop.eup %1137 }
 0x769   :  { %v530_v43 = vmul.f32 %v1138_v42, %v1136_v38 }
 0x76b   :  { %v531_v32 = vpack.c.bf16 %v530_v43, %v530_v43 }
 0x76d   :  { %533 = vrot.lane.b32.xlu1 %v531_v32, %s1277_s3 }
 0x7df   :  { %v534_v36 = vpop.permute.xlu1 %533 }
 0x7e0   :  { %1028 = vmatmul.mubr.msk.bf16.vlgmr.msra.gmra.mrb[8].mxu1 %vm221_vm5, %v534_v36 }
 0x7e1   :  { %703 = vmatpush1.bf16.msra.mxu1 %v1345_v4  ;;  %734 = vmatprep.mubr.bf16.mxu1 %v1275_v0 }
 0x7e2   :  { %704 = vmatprep.subr.bf16.mxu1 %v1349_v8 }
 0x7e5   :  { %705 = vmatpush1.bf16.msra.mxu1 %v1351_v10 }
 0x7e6   :  { %706 = vmatprep.subr.bf16.mxu1 %v1354_v14 }
 0x7e9   :  { %707 = vmatpush1.bf16.msra.mxu1 %v1356_v16 }
 0x7ea   :  { %708 = vmatprep.subr.bf16.mxu1 %v1365_v21 }
 0x7ed   :  { %709 = vmatpush1.bf16.msra.mxu1 %v1369_v23 }
 0x7ee   :  { %850 = vmatprep.subr.bf16.mxu1 %v1343_v2 }
 0x8b3   :  { %v580_v44 = vpop.f32.mrb[8].mxu1 }
 0x8b4   :  { %v581_v45 = vadd.f32 %v580_v44, %v1427_v13  ;;  %v582_v34 = vpop.f32.mrb[9].mxu1 }
 0x8b5   :  { %v583_v41 = vadd.f32 %v582_v34, %v1430_v15  ;;  %v584_v46 = vpop.f32.mrb[10].mxu1 }
 0x8b6   :  { %v1029_v47 = vmul.f32 -1.442695, %v581_v45  ;;  %v585_v49 = vpop.f32.mrb[11].mxu1 }
 0x8b7   :  { %v1030_v2 = vmul.f32 -1.442695, %v583_v41 }
 0x8b8   :  { %1139 = vpow2.f32 %v1029_v47 }
 0x8b9   :  { %1141 = vtanh.f32 %v583_v41 }
 0x8c2   :  { %v1140_v50 = vpop.eup %1139 }
 0x8c3   :  { %v593_v51 = vadd.f32 1.0, %v1140_v50  ;;  %v1142_v52 = vpop.eup %1141 }
 0x8c5   :  { %1143 = vrcp.f32 %v593_v51 }
 0x8c6   :  { %1145 = vpow2.f32 %v1030_v2 }
 0x8cf   :  { %v1144_v54 = vpop.eup %1143 }
 0x8d0   :  { %v601_v55 = vmul.f32 %v1144_v54, %v1142_v52  ;;  %v1146_v56 = vpop.eup %1145  ;;  %v600_v58 = vmul.f32 %v1144_v54, %v528_v1 }
 0x8d1   :  { %v594_v13 = vadd.f32 1.0, %v1146_v56 }
 0x8d2   :  { %603 = vrot.lane.b32.xlu0 %v601_v55, %s1277_s3 }
 0x8d3   :  { %1147 = vrcp.f32 %v594_v13 }
 0x8dd   :  { %v1148_v60 = vpop.eup %1147 }
 0x944   :  { %v604_v57 = vpop.permute.xlu0 %603 }
 0x945   :  { %v606_v15 = vadd.f32 %v604_v57, %v600_v58 }
 0x947   :  { %1149 = vtanh.f32 %v606_v15 }
 0x951   :  { %v1150_v63 = vpop.eup %1149 }
 0x952   :  { %v608_v61 = vmul.f32 %v1150_v63, %v1148_v60 }
 0x954   :  { %v609_v24 = vpack.c.bf16 %v608_v61, %v608_v61 }
 0x956   :  { %611 = vrot.lane.b32.xlu1 %v609_v24, %s1277_s3 }
 0x9c8   :  { %v612_v62 = vpop.permute.xlu1 %611 }
 0x9c9   :  { %1031 = vmatmul.mubr.msk.bf16.vlgmr.msra.gmra.mrb[12].mxu0 %vm221_vm5, %v612_v62 }
 0x9ca   :  { %781 = vmatpush1.bf16.msra.mxu0 %v1345_v4  ;;  %812 = vmatprep.mubr.bf16.mxu0 %v1275_v0 }
 0x9cb   :  { %782 = vmatprep.subr.bf16.mxu0 %v1349_v8 }
 0x9ce   :  { %783 = vmatpush1.bf16.msra.mxu0 %v1351_v10 }
 0x9cf   :  { %784 = vmatprep.subr.bf16.mxu0 %v1354_v14 }
 0x9d2   :  { %785 = vmatpush1.bf16.msra.mxu0 %v1356_v16 }
 0x9d3   :  { %786 = vmatprep.subr.bf16.mxu0 %v1365_v21 }
 0x9d6   :  { %787 = vmatpush1.bf16.msra.mxu0 %v1369_v23 }
 0xa9c   :  { %v658_v3 = vpop.f32.mrb[12].mxu0 }
 0xa9d   :  { %v659_v5 = vadd.f32 %v658_v3, %v1433_v17  ;;  %v660_v6 = vpop.f32.mrb[13].mxu0 }
 0xa9e   :  { %v661_v7 = vadd.f32 %v660_v6, %v1436_v27  ;;  %v662_v9 = vpop.f32.mrb[14].mxu0 }
 0xa9f   :  { %v1032_v11 = vmul.f32 -1.442695, %v659_v5  ;;  %v663_v12 = vpop.f32.mrb[15].mxu0 }
 0xaa0   :  { %v1033_v48 = vmul.f32 -1.442695, %v661_v7 }
 0xaa1   :  { %1151 = vpow2.f32 %v1032_v11 }
 0xaa2   :  { %1153 = vtanh.f32 %v661_v7 }
 0xaab   :  { %v1152_v18 = vpop.eup %1151 }
 0xaac   :  { %v671_v19 = vadd.f32 1.0, %v1152_v18  ;;  %v1154_v20 = vpop.eup %1153 }
 0xaae   :  { %1155 = vrcp.f32 %v671_v19 }
 0xaaf   :  { %1157 = vpow2.f32 %v1033_v48 }
 0xab8   :  { %v1156_v22 = vpop.eup %1155 }
 0xab9   :  { %v679_v25 = vmul.f32 %v1156_v22, %v1154_v20  ;;  %v1158_v26 = vpop.eup %1157  ;;  %v678_v28 = vmul.f32 %v1156_v22, %v606_v15 }
 0xaba   :  { %v672_v17 = vadd.f32 1.0, %v1158_v26 }
 0xabb   :  { %681 = vrot.lane.b32.xlu0 %v679_v25, %s1277_s3 }
 0xabc   :  { %1159 = vrcp.f32 %v672_v17 }
 0xac6   :  { %v1160_v59 = vpop.eup %1159 }
 0xb2d   :  { %v682_v53 = vpop.permute.xlu0 %681 }
 0xb2e   :  { %v684_v27 = vadd.f32 %v682_v53, %v678_v28 }
 0xb30   :  { %1161 = vtanh.f32 %v684_v27 }
 0xb3a   :  { %v1162_v31 = vpop.eup %1161 }
 0xb3b   :  { %v686_v37 = vmul.f32 %v1162_v31, %v1160_v59  ;;  %v1278_v31 = vmov 0.0  }
 0xb3c   :  { %1050 = vmatprep.subr.bf16.mxu0 %v1278_v31 }
 0xb3d   :  { %v687_v1 = vpack.c.bf16 %v686_v37, %v686_v37 }
 0xb3f   :  { %689 = vrot.lane.b32.xlu1 %v687_v1, %s1277_s3 }
 0xbb1   :  { %v690_v38 = vpop.permute.xlu1 %689 }
 0xbb2   :  { %1034 = vmatmul.mubr.msk.bf16.vlgmr.msra.gmra.mrb[12].mxu1 %vm221_vm5, %v690_v38 }
 0xbb3   :  { %851 = vmatpush1.bf16.msra.mxu1 %v1345_v4  ;;  %882 = vmatprep.mubr.bf16.mxu1 %v1275_v0 }
 0xbb4   :  { %852 = vmatprep.subr.bf16.mxu1 %v1349_v8 }
 0xbb7   :  { %853 = vmatpush1.bf16.msra.mxu1 %v1351_v10 }
 0xbb8   :  { %854 = vmatprep.subr.bf16.mxu1 %v1354_v14 }
 0xbbb   :  { %855 = vmatpush1.bf16.msra.mxu1 %v1356_v16 }
 0xbbc   :  { %856 = vmatprep.subr.bf16.mxu1 %v1365_v21 }
 0xbbf   :  { %857 = vmatpush1.bf16.msra.mxu1 %v1369_v23 }
 0xc85   :  { %v736_v42 = vpop.f32.mrb[12].mxu1 }
 0xc86   :  { %v737_v43 = vadd.f32 %v736_v42, %v1439_v33  ;;  %v738_v32 = vpop.f32.mrb[13].mxu1 }
 0xc87   :  { %v739_v4 = vadd.f32 %v738_v32, %v1442_v35  ;;  %v740_v36 = vpop.f32.mrb[14].mxu1 }
 0xc88   :  { %v1035_v0 = vmul.f32 -1.442695, %v737_v43  ;;  %v741_v44 = vpop.f32.mrb[15].mxu1 }
 0xc89   :  { %v1036_v21 = vmul.f32 -1.442695, %v739_v4 }
 0xc8a   :  { %1163 = vpow2.f32 %v1035_v0 }
 0xc8b   :  { %1165 = vtanh.f32 %v739_v4 }
 0xc94   :  { %v1164_v8 = vpop.eup %1163 }
 0xc95   :  { %v749_v10 = vadd.f32 1.0, %v1164_v8  ;;  %v1166_v14 = vpop.eup %1165 }
 0xc97   :  { %1167 = vrcp.f32 %v749_v10  ;;  %v1043_v10 = vld [vmem:[%s1572_s5] ss:$0 sm:$0xff] }
 0xc98   :  { %1169 = vpow2.f32 %v1036_v21 }
 0xca1   :  { %v1168_v16 = vpop.eup %1167 }
 0xca2   :  { %v757_v45 = vmul.f32 %v1168_v16, %v1166_v14  ;;  %v1170_v23 = vpop.eup %1169  ;;  %v756_v34 = vmul.f32 %v1168_v16, %v684_v27 }
 0xca3   :  { %v750_v33 = vadd.f32 1.0, %v1170_v23 }
 0xca4   :  { %759 = vrot.lane.b32.xlu0 %v757_v45, %s1277_s3 }
 0xca5   :  { %1171 = vrcp.f32 %v750_v33 }
 0xcaf   :  { %v1172_v46 = vpop.eup %1171 }
 0xd16   :  { %v760_v41 = vpop.permute.xlu0 %759 }
 0xd17   :  { %v762_v35 = vadd.f32 %v760_v41, %v756_v34 }
 0xd19   :  { %1173 = vtanh.f32 %v762_v35 }
 0xd23   :  { %v1174_v47 = vpop.eup %1173 }
 0xd24   :  { %v764_v49 = vmul.f32 %v1174_v47, %v1172_v46 }
 0xd26   :  { %v765_v50 = vpack.c.bf16 %v764_v49, %v764_v49 }
 0xd28   :  { %767 = vrot.lane.b32.xlu1 %v765_v50, %s1277_s3 }
 0xd9a   :  { %v768_v51 = vpop.permute.xlu1 %767 }
 0xd9b   :  { %1037 = vmatmul.mubr.msk.bf16.vlgmr.msra.gmra.mrb[16].mxu0 %vm221_vm5, %v768_v51 }
 0xd9c   :  { %1054 = vmatprep.mubr.msk.bf16.mxu0 %vm1279_vm6, %v1278_v31 }
 0xe6e   :  { %v814_v52 = vpop.f32.mrb[16].mxu0 }
 0xe6f   :  { %v815_v54 = vadd.f32 %v814_v52, %v1445_v39  ;;  %v816_v55 = vpop.f32.mrb[17].mxu0 }
 0xe70   :  { %v817_v2 = vadd.f32 %v816_v55, %v1448_v40  ;;  %v818_v56 = vpop.f32.mrb[18].mxu0 }
 0xe71   :  { %v1038_v13 = vmul.f32 -1.442695, %v815_v54  ;;  %v819_v58 = vpop.f32.mrb[19].mxu0 }
 0xe72   :  { %v1039_v24 = vmul.f32 -1.442695, %v817_v2 }
 0xe73   :  { %1175 = vpow2.f32 %v1038_v13 }
 0xe74   :  { %1177 = vtanh.f32 %v817_v2 }
 0xe7d   :  { %v1176_v57 = vpop.eup %1175 }
 0xe7e   :  { %v827_v15 = vadd.f32 1.0, %v1176_v57  ;;  %v1178_v60 = vpop.eup %1177 }
 0xe80   :  { %1179 = vrcp.f32 %v827_v15 }
 0xe81   :  { %1181 = vpow2.f32 %v1039_v24 }
 0xe8a   :  { %v1180_v63 = vpop.eup %1179 }
 0xe8b   :  { %v835_v61 = vmul.f32 %v1180_v63, %v1178_v60  ;;  %v1182_v62 = vpop.eup %1181  ;;  %v834_v3 = vmul.f32 %v1180_v63, %v762_v35 }
 0xe8c   :  { %v828_v39 = vadd.f32 1.0, %v1182_v62 }
 0xe8d   :  { %837 = vrot.lane.b32.xlu0 %v835_v61, %s1277_s3 }
 0xe8e   :  { %1183 = vrcp.f32 %v828_v39 }
 0xe98   :  { %v1184_v6 = vpop.eup %1183 }
 0xeff   :  { %v838_v5 = vpop.permute.xlu0 %837 }
 0xf00   :  { %v840_v40 = vadd.f32 %v838_v5, %v834_v3 }
 0xf02   :  { %1185 = vtanh.f32 %v840_v40 }
 0xf0c   :  { %v1186_v7 = vpop.eup %1185 }
 0xf0d   :  { %v842_v9 = vmul.f32 %v1186_v7, %v1184_v6 }
 0xf0f   :  { %v843_v11 = vpack.c.bf16 %v842_v9, %v842_v9 }
 0xf11   :  { %845 = vrot.lane.b32.xlu1 %v843_v11, %s1277_s3 }
 0xf83   :  { %v846_v12 = vpop.permute.xlu1 %845 }
 0xf84   :  { %1040 = vmatmul.mubr.msk.bf16.vlgmr.msra.gmra.mrb[16].mxu1 %vm221_vm5, %v846_v12 }
0x1057   :  { %v884_v18 = vpop.f32.mrb[16].mxu1 }
0x1058   :  { %v885_v19 = vadd.f32 %v884_v18, %v1398_v29  ;;  %v886_v20 = vpop.f32.mrb[17].mxu1  ;;  %v1089_v29 = vld [vmem:[%s1571_s4] sm:$0xff]  }
0x1059   :  { %v888_v22 = vpop.f32.mrb[18].mxu1  ;;  %v887_v26 = vadd.f32 %v886_v20, %v1400_v30  ;;  %1051 = vmatpush3.bf16.msra.mxu0 %v1089_v29  ;;  %v1090_v30 = vld [vmem:[%s1571_s4 + $0x8] sm:$0xff]  }
0x105a   :  { %v1041_v25 = vmul.f32 -1.442695, %v885_v19  ;;  %v889_v48 = vpop.f32.mrb[19].mxu1  ;;  %1052 = vmatprep.subr.bf16.mxu0 %v1278_v31 }
0x105b   :  { %v1042_v37 = vmul.f32 -1.442695, %v887_v26 }
0x105c   :  { %1187 = vpow2.f32 %v1041_v25 }
0x105d   :  { %1189 = vtanh.f32 %v887_v26  ;;  %1053 = vmatpush3.bf16.msra.mxu0 %v1090_v30 }
0x1066   :  { %v1188_v17 = vpop.eup %1187 }
0x1067   :  { %v897_v28 = vadd.f32 1.0, %v1188_v17  ;;  %v1190_v53 = vpop.eup %1189 }
0x1069   :  { %1191 = vrcp.f32 %v897_v28 }
0x106a   :  { %1193 = vpow2.f32 %v1042_v37 }
0x1073   :  { %v1192_v27 = vpop.eup %1191 }
0x1074   :  { %v905_v59 = vmul.f32 %v1192_v27, %v1190_v53  ;;  %v1194_v1 = vpop.eup %1193  ;;  %v904_v42 = vmul.f32 %v1192_v27, %v840_v40 }
0x1075   :  { %v898_v38 = vadd.f32 1.0, %v1194_v1 }
0x1076   :  { %907 = vrot.lane.b32.xlu0 %v905_v59, %s1277_s3 }
0x1077   :  { %1195 = vrcp.f32 %v898_v38 }
0x1081   :  { %v1196_v4 = vpop.eup %1195 }
0x10e8   :  { %v908_v43 = vpop.permute.xlu0 %907 }
0x10e9   :  { %v910_v32 = vadd.f32 %v908_v43, %v904_v42 }
0x10eb   :  { %1197 = vtanh.f32 %v910_v32 }
0x10f5   :  { %v1198_v36 = vpop.eup %1197 }
0x10f6   :  { %v912_v0 = vmul.f32 %v1198_v36, %v1196_v4 }
0x10f8   :  { %v913_v44 = vpack.c.bf16 %v912_v0, %v912_v0 }
0x10fa   :  { %926 = vrot.lane.b32.xlu1 %v913_v44, %s1280_s30 }
0x116c   :  { %v927_v8 = vpop.permute.xlu1 %926 }
0x116d   :  { %1055 = vmatmul.mubr.msk.bf16.vlgmr.msra.gmra.mrb[20].mxu0 %vm940_vm7, %v927_v8 }
0x1240   :  { %v978_v14 = vpop.f32.mrb[20].mxu0 }
0x1241   :  { %v979_v16 = vadd.f32 %v1043_v10, %v978_v14  ;;  %v1056_v45 = vpop.f32.mrb[21].mxu0 }
0x1242   :  { %v981_v21 = vpop.f32.mrb[22].mxu0 }
0x1243   :  { %v1057_v23 = vpop.f32.mrb[23].mxu0  ;;  %985 = vst.msk [vmem:[#allocation7] sm:$0x3] %vm984_vm8, %v979_v16 }
0x1244   :  { %1254 = shalt.err (!%p1251_p6)
}
0x1245   :  { %s1255_s5 = scalar_lea.hbm %s1573_s6, 32 }
0x1246   :  { %p1256_p7 = scmp.ne.s32.totalorder %s1573_s6, %s1255_s5  ;;  %p1259_p8 = scmp.lt.u32.totalorder %s1255_s5, %s1573_s6 }
0x1248   :  { %p1261_p9 = pnand %p1259_p8, %p1256_p7 }
0x124a   :  { %1264 = shalt.err (!%p1261_p9)
}
0x124b   :  { %995 = dma.vmem_to_hbm [thread:$0]  %s993_s9, 32, %s1573_s6, [#allocation4]  }
0x124c   :  { %1269 = dma.done.wait [#allocation4], 32  }
0x124d   :  { %1270 = vsyncadd [#allocation4], 4294967264 }
0x124e   :  { %999 = vsyncpa [#allocation3], 1 }
0x124f   :  { %1000 = vsyncpa [#allocation6], 1 }
0x1250   :  { %1001 = vsyncpa [#allocation4], 1 }

</bundles_post_ra>
